<compile_context>
chip_gen: v5e
topology: v5e:2x2
jax: 0.10.0
libtpu: 0.0.40
codegen_flags: <defaults>
</compile_context>

<pallas_src>
import jax
import jax.numpy as jnp
from jax.experimental import pallas as pl
from jax.experimental.pallas import tpu as pltpu


def _mul_t_cat_kernel(x1t_ref, x2_ref, o_ref):
    # x1t_ref : (N, M) VMEM  -- already transposed in the wrapper
    # x2_ref  : (1, M) SMEM  -- tiny scalar row, read element-by-element
    # o_ref   : (N, 6*M) VMEM
    n, m = x1t_ref.shape
    x1t = x1t_ref[...]

    # v1 = x1t * x2 (broadcast over rows).  Built from SMEM scalars with a
    # lane-index select chain: pure VPU work (iota / cmp / select / mul),
    # no VMEM tile or DMA for x2.
    col = jax.lax.broadcasted_iota(jnp.int32, (n, m), 1)
    v1 = x1t * x2_ref[0, 0]
    for k in range(1, m):
        v1 = jnp.where(col == k, x1t * x2_ref[0, k], v1)

    # cat([v1] * 6, axis=1) via 6 static slice-stores of the same value.
    for r in range(6):
        o_ref[:, r * m:(r + 1) * m] = v1


def mul_t_cat(x1, x2):
    M, N = x1.shape
    assert x2.shape == (1, M), "x2 must broadcast against x1.T"
    out_shape = jax.ShapeDtypeStruct((N, 6 * M), x1.dtype)
    # Hoist the transpose out of the kernel: XLA folds it into the producing
    # op's layout, keeping the kernel body off the XLU entirely.
    x1t = x1.T
    return pl.pallas_call(
        _mul_t_cat_kernel,
        out_shape=out_shape,
        in_specs=[
            # Tiny arrays: whole-array blocks (legal: block == full dims).
            pl.BlockSpec((N, M), lambda: (0, 0)),
            # 8 bytes of data -> SMEM, no VMEM tile / DMA descriptor.
            pl.BlockSpec(memory_space=pltpu.MemorySpace.SMEM),
        ],
        out_specs=pl.BlockSpec((N, 6 * M), lambda: (0, 0)),
    )(x1t, x2)


def reference(x1, x2):
    v1 = x1.T * x2
    return jnp.concatenate([v1] * 6, axis=1)


if __name__ == "__main__":
    key = jax.random.PRNGKey(0)
    k1, k2 = jax.random.split(key)
    x1 = jax.random.uniform(k1, (2, 4), dtype=jnp.float32)   # like torch.rand((2, 4))
    x2 = jax.random.uniform(k2, (1, 2), dtype=jnp.float32)   # broadcast-compatible with x1.T

    out = mul_t_cat(x1, x2)
    jax.block_until_ready(out)

    ref = reference(x1, x2)
    assert out.shape == (4, 12), out.shape
    assert jnp.allclose(out, ref, atol=1e-6), "mismatch vs reference"
    print("KERNEL_OK")
</pallas_src>

<mosaic_0001>
module attributes {stable_mosaic.version = 11 : i64} {
  func.func @_mul_t_cat_kernel(%arg0: memref<4x2xf32, #tpu.memory_space<vmem>>, %arg1: memref<1x2xf32, #tpu.memory_space<smem>>, %arg2: memref<4x12xf32, #tpu.memory_space<vmem>>) attributes {dimension_semantics = [], scalar_prefetch = 0 : i64, scratch_operands = 0 : i64, tpu.core_type = #tpu.core_type<tc>} {
    %c0 = arith.constant 0 : index
    %c0_0 = arith.constant 0 : index
    %0 = vector.load %arg0[%c0, %c0_0] : memref<4x2xf32, #tpu.memory_space<vmem>>, vector<4x2xf32>
    %1 = tpu.iota {dimensions = array<i32: 1>} : vector<4x2xi32>
    %c0_1 = arith.constant 0 : index
    %c0_2 = arith.constant 0 : index
    %2 = memref.load %arg1[%c0_1, %c0_2] : memref<1x2xf32, #tpu.memory_space<smem>>
    %3 = vector.broadcast %2 : f32 to vector<4x2xf32>
    %4 = arith.mulf %0, %3 : vector<4x2xf32>
    %c1_i32 = arith.constant 1 : i32
    %5 = vector.broadcast %c1_i32 : i32 to vector<4x2xi32>
    %6 = arith.cmpi eq, %1, %5 : vector<4x2xi32>
    %c0_3 = arith.constant 0 : index
    %c1 = arith.constant 1 : index
    %7 = memref.load %arg1[%c0_3, %c1] : memref<1x2xf32, #tpu.memory_space<smem>>
    %8 = vector.broadcast %7 : f32 to vector<4x2xf32>
    %9 = arith.mulf %0, %8 : vector<4x2xf32>
    %10 = arith.select %6, %9, %4 : vector<4x2xi1>, vector<4x2xf32>
    %c0_4 = arith.constant 0 : index
    %c0_5 = arith.constant 0 : index
    %11 = vector.load %arg2[%c0_4, %c0_5] : memref<4x12xf32, #tpu.memory_space<vmem>>, vector<4x2xf32>
    tpu.vector_store %arg2[%c0_4, %c0_5], %10 {strides = array<i32>} : memref<4x12xf32, #tpu.memory_space<vmem>>, vector<4x2xf32>,
    %c0_6 = arith.constant 0 : index
    %c2 = arith.constant 2 : index
    %12 = vector.load %arg2[%c0_6, %c2] : memref<4x12xf32, #tpu.memory_space<vmem>>, vector<4x2xf32>
    tpu.vector_store %arg2[%c0_6, %c2], %10 {strides = array<i32>} : memref<4x12xf32, #tpu.memory_space<vmem>>, vector<4x2xf32>,
    %c0_7 = arith.constant 0 : index
    %c4 = arith.constant 4 : index
    %13 = vector.load %arg2[%c0_7, %c4] : memref<4x12xf32, #tpu.memory_space<vmem>>, vector<4x2xf32>
    tpu.vector_store %arg2[%c0_7, %c4], %10 {strides = array<i32>} : memref<4x12xf32, #tpu.memory_space<vmem>>, vector<4x2xf32>,
    %c0_8 = arith.constant 0 : index
    %c6 = arith.constant 6 : index
    %14 = vector.load %arg2[%c0_8, %c6] : memref<4x12xf32, #tpu.memory_space<vmem>>, vector<4x2xf32>
    tpu.vector_store %arg2[%c0_8, %c6], %10 {strides = array<i32>} : memref<4x12xf32, #tpu.memory_space<vmem>>, vector<4x2xf32>,
    %c0_9 = arith.constant 0 : index
    %c8 = arith.constant 8 : index
    %15 = vector.load %arg2[%c0_9, %c8] : memref<4x12xf32, #tpu.memory_space<vmem>>, vector<4x2xf32>
    tpu.vector_store %arg2[%c0_9, %c8], %10 {strides = array<i32>} : memref<4x12xf32, #tpu.memory_space<vmem>>, vector<4x2xf32>,
    %c0_10 = arith.constant 0 : index
    %c10 = arith.constant 10 : index
    %16 = vector.load %arg2[%c0_10, %c10] : memref<4x12xf32, #tpu.memory_space<vmem>>, vector<4x2xf32>
    tpu.vector_store %arg2[%c0_10, %c10], %10 {strides = array<i32>} : memref<4x12xf32, #tpu.memory_space<vmem>>, vector<4x2xf32>,
    return
  }
}

</mosaic_0001>

<bundles_post_ra>
// kernel: tpu_custom_call.1
= control target key start
LH: loop header
LB: loop body
LE: loop exit
PB: predicated region body
PF: predicated region fallthrough
CT: control target
= control target key end

     0   :  { %7 = vsyncpa [#allocation4], 0  ;;  %s160_s0 = inlined_call_operand.vmem [shape: f32[4,2], index: 0, kind: input, shape index: {}]   ;;  %s161_s1 = inlined_call_operand.vmem [shape: f32[1,2], index: 1, kind: input, shape index: {}]   ;;  %s162_s2 = inlined_call_operand.hbm [shape: f32[4,12], index: 2, kind: output, shape index: {}]  }
   0x1   :  { %8 = vsyncpa [#allocation3], 0  ;;  %s16_s11 = sshll.u32 %s161_s1, 4  ;;  %s129_s12 = smov [#allocation2]   ;;  %s17_s11 = int_to_ptr.vmem [resolvable:$true] %s16_s11 }
   0x2   :  { %19 = dma.vmem_to_smem %s17_s11, 16, %s129_s12, [#allocation4]  }
   0x3   :  { %125 = dma.done.wait [#allocation4], 16  }
   0x4   :  { %126 = vsyncadd [#allocation4], 4294967280 }
   0x5   :  { %24 = sfence }
   0x6   :  { %v26_v0 = vlaneseq  ;;  %s28_s13 = sld [smem:[#allocation2]]  ;;  %v25_v2 = vld [vmem:[%s160_s0] sm:$0xf]  ;;  %vm36_vm1 = vcmask 11264   ;;  %s130_s1 = smov 2   ;;  %vm42_vm2 = vcmask 27664  }
   0x7   :  { %s81_s14 = sld [smem:[#allocation2 + $0x1]]  ;;  %s131_s17 = smov 6   ;;  %vm47_vm3 = vcmask 44064   ;;  %vm52_vm4 = vcmask 60464   ;;  %vm57_vm5 = vcmask 76864   ;;  %vm62_vm6 = vcmask 93264  }
   0x8   :  { %v27_v1 = vand.u32 127, %v26_v0  ;;  %s132_s18 = smov 10   ;;  %s133_s19 = smov 4  }
   0x9   :  { %s134_s20 = smov 8   ;;  %s135_s0 = smov [#allocation5]  }
   0xa   :  { %vm31_vm0 = vcmp.eq.s32.totalorder %v27_v1, 1  ;;  %s69_s21 = sshll.u32 %s135_s0, 4  ;;  %s71_s24 = sshll.u32 %s162_s2, 4  ;;  %s70_s21 = int_to_ptr.vmem [resolvable:$true] %s69_s21  ;;  %s72_s24 = int_to_ptr.hbm [resolvable:$true] %s71_s24 }
   0xc   :  { %v29_v3 = vstv %s28_s13 }
   0xd   :  { %v30_v4 = vmul.f32 %v29_v3, %v25_v2  ;;  %v33_v5 = vstv %s81_s14 }
   0xe   :  { %v34_v6 = vmul.f32 %v33_v5, %v25_v2 }
  0x10   :  { %v35_v7 = vsel %vm31_vm0, %v34_v6, %v30_v4 }
  0x11   :  { %39 = vrot.lane.b32.xlu0 %v35_v7, %s130_s1  ;;  %49 = vrot.lane.b32.xlu1 %v35_v7, %s131_s17  ;;  %37 = vst.msk [vmem:[#allocation5] sm:$0xf] %vm36_vm1, %v35_v7 }
  0x12   :  { %59 = vrot.lane.b32.xlu2 %v35_v7, %s132_s18 }
  0x19   :  { %44 = vrot.lane.b32.xlu0 %v35_v7, %s133_s19  ;;  %54 = vrot.lane.b32.xlu1 %v35_v7, %s134_s20 }
  0x6c   :  { %v60_v12 = vpop.permute.xlu2 %59 }
  0x83   :  { %v40_v8 = vpop.permute.xlu0 %39  ;;  %v50_v9 = vpop.permute.xlu1 %49 }
  0x84   :  { %43 = vst.msk [vmem:[#allocation5] sm:$0xf] %vm42_vm2, %v40_v8 }
  0x8b   :  { %v45_v10 = vpop.permute.xlu0 %44  ;;  %v55_v11 = vpop.permute.xlu1 %54 }
  0x8c   :  { %48 = vst.msk [vmem:[#allocation5] sm:$0xf] %vm47_vm3, %v45_v10 }
  0x8d   :  { %53 = vst.msk [vmem:[#allocation5] sm:$0xf] %vm52_vm4, %v50_v9 }
  0x8e   :  { %58 = vst.msk [vmem:[#allocation5] sm:$0xf] %vm57_vm5, %v55_v11 }
  0x8f   :  { %63 = vst.msk [vmem:[#allocation5] sm:$0xf] %vm62_vm6, %v60_v12 }
  0x90   :  { %74 = dma.vmem_to_hbm [thread:$0]  %s70_s21, 64, %s72_s24, [#allocation3]  }
  0x91   :  { %127 = dma.done.wait [#allocation3], 64  }
  0x92   :  { %128 = vsyncadd [#allocation3], 4294967232 }
  0x93   :  { %79 = vsyncpa [#allocation3], 1 }
  0x94   :  { %80 = vsyncpa [#allocation4], 1 }

</bundles_post_ra>
